<compile_context>
chip_gen: v7x
topology: tpu7x:2x2x1
jax: 0.10.0
libtpu: 0.0.40
codegen_flags: <defaults>
</compile_context>

<pallas_src>
import numpy as np
import jax
import jax.numpy as jnp
from jax.experimental import pallas as pl
from jax.experimental.pallas import tpu as pltpu

# ---------------- configuration (mirrors MTGNNLayer.__init__ args) ------------
DILATION_EXPONENTIAL = 1
RF_SIZE_I = 1
KERNEL_SIZE = 7
J = 0
RESIDUAL_CHANNELS = 8
CONV_CHANNELS = 8
SKIP_CHANNELS = 16
KERNEL_SET = [2, 3, 6, 7]
NEW_DILATION = 1
LAYER_NORM_AFFINE = True
GCN_TRUE = False          # TODO(synk): MixPropModified/GCNConv (torch_geometric) branch not implemented
SEQ_LENGTH = 16
RECEPTIVE_FIELD = 8
DROPOUT = 0.3             # forward is run with training=False -> dropout is identity
NUM_NODES = 8
BATCH = 2
EPS = 1e-5

USE_BF16_WEIGHTS = True   # bf16 matmul weights (halves weight DMA; native MXU path on v6e/v7x)
MXU_DTYPE = jnp.bfloat16 if USE_BF16_WEIGHTS else jnp.float32

# receptive-field arithmetic exactly as in the torch module
if DILATION_EXPONENTIAL > 1:
    RF_SIZE_J = int(RF_SIZE_I + (KERNEL_SIZE - 1)
                    * (DILATION_EXPONENTIAL ** J - 1) / (DILATION_EXPONENTIAL - 1))
else:
    RF_SIZE_J = RF_SIZE_I + J * (KERNEL_SIZE - 1)
T_OUT = (SEQ_LENGTH - RF_SIZE_J + 1) if SEQ_LENGTH > RECEPTIVE_FIELD else (RECEPTIVE_FIELD - RF_SIZE_J + 1)
SKIP_KERNEL = T_OUT
# With padding='same' convs the time length never shrinks; the torch layer_norm
# weight shape only matches when T_OUT == SEQ_LENGTH (rf_size_j == 1).
assert T_OUT == SEQ_LENGTH
assert CONV_CHANNELS % len(KERNEL_SET) == 0

# flattened (time*channel) widths used by the kernel
TCR = SEQ_LENGTH * RESIDUAL_CHANNELS     # 128
TCC = SEQ_LENGTH * CONV_CHANNELS         # 128
TCS = SEQ_LENGTH * SKIP_CHANNELS         # 256
assert NUM_NODES % 8 == 0                # per-sample block rows stay sublane-aligned
assert TCR % 128 == 0 and TCS % 128 == 0 # lane-dense blocks

# advisory cost numbers for the XLA scheduler (review item: pass a CostEstimate)
_M = BATCH * NUM_NODES
COST_FLOPS = 2 * _M * (TCR * 2 * TCC + TCC * (TCS + TCR))
COST_TRANSCENDENTALS = _M * 2 * TCC + BATCH
COST_BYTES = ((TCR * 2 * TCC + TCC * (TCS + TCR)) * (2 if USE_BF16_WEIGHTS else 4)  # weights
              + (2 * TCC + TCS + TCR) * 4                                           # biases
              + 2 * NUM_NODES * TCR * 4                                             # lw / lb
              + 2 * (_M * TCR + _M * TCS) * 4)                                      # x/xs in + out


# ---------------- deterministic parameter init --------------------------------
def xavier_uniform(key, shape, fan_in, fan_out):
    bound = float(np.sqrt(6.0 / (fan_in + fan_out)))
    return jax.random.uniform(key, shape, jnp.float32, -bound, bound)


def init_params(key):
    params = {}
    c_br = CONV_CHANNELS // len(KERNEL_SET)
    keys = iter(jax.random.split(key, 32))
    for name in ("filter", "gate"):
        Ws, Bs = [], []
        for k in KERNEL_SET:
            w = xavier_uniform(next(keys), (c_br, RESIDUAL_CHANNELS, 1, k),
                               RESIDUAL_CHANNELS * k, c_br * k)
            b = jax.random.uniform(next(keys), (c_br,), jnp.float32, 0.0, 1.0)
            Ws.append(np.asarray(w))
            Bs.append(np.asarray(b))
        params[name] = (Ws, Bs)
    params["skip"] = (
        np.asarray(xavier_uniform(next(keys), (SKIP_CHANNELS, CONV_CHANNELS, 1, SKIP_KERNEL),
                                  CONV_CHANNELS * SKIP_KERNEL, SKIP_CHANNELS * SKIP_KERNEL)),
        np.asarray(jax.random.uniform(next(keys), (SKIP_CHANNELS,), jnp.float32, 0.0, 1.0)))
    params["res"] = (
        np.asarray(xavier_uniform(next(keys), (RESIDUAL_CHANNELS, CONV_CHANNELS, 1, 1),
                                  CONV_CHANNELS, RESIDUAL_CHANNELS)),
        np.asarray(jax.random.uniform(next(keys), (RESIDUAL_CHANNELS,), jnp.float32, 0.0, 1.0)))
    # LayerNormalization affine params (torch shape (C_res, N, T)); MTGNNLayer's
    # _reset_parameters re-inits them with xavier_uniform (they are 3-D).
    params["ln_w"] = np.asarray(xavier_uniform(
        next(keys), (RESIDUAL_CHANNELS, NUM_NODES, T_OUT),
        NUM_NODES * T_OUT, RESIDUAL_CHANNELS * T_OUT))
    params["ln_b"] = np.asarray(xavier_uniform(
        next(keys), (RESIDUAL_CHANNELS, NUM_NODES, T_OUT),
        NUM_NODES * T_OUT, RESIDUAL_CHANNELS * T_OUT))
    return params


# -------- turn (1,k) 'same'-padded convs into banded (T*Cin, T*Cout) matmuls ---
def conv1xk_to_matmul(W, b, dilation, T):
    """Torch Conv2d weight (Cout, Cin, 1, k), padding='same' along time, as a
    dense matrix acting on x flattened as column index t*Cin + ci."""
    Cout, Cin, _, k = W.shape
    total = dilation * (k - 1)
    pad_left = total // 2                      # PyTorch 'same' rule (asymmetric for even k)
    Wbig = np.zeros((T * Cin, T * Cout), np.float32)
    bbig = np.zeros((1, T * Cout), np.float32)
    for t_out in range(T):
        for tau in range(k):
            t_in = t_out + tau * dilation - pad_left
            if 0 <= t_in < T:
                Wbig[t_in * Cin:(t_in + 1) * Cin,
                     t_out * Cout:(t_out + 1) * Cout] += W[:, :, 0, tau].T
        bbig[0, t_out * Cout:(t_out + 1) * Cout] = b
    return Wbig, bbig


def inception_to_matmul(Ws, Bs, dilation, T, Cin, Ctotal):
    """DilatedInception: concat branch outputs along channels (all 'same' length)."""
    bw, bb = [], []
    for W, b in zip(Ws, Bs):
        wbig, bbig = conv1xk_to_matmul(W, b, dilation, T)
        c_br = W.shape[0]
        bw.append(wbig.reshape(T * Cin, T, c_br))
        bb.append(bbig.reshape(1, T, c_br))
    Wcat = np.concatenate(bw, axis=-1).reshape(T * Cin, T * Ctotal)
    bcat = np.concatenate(bb, axis=-1).reshape(1, T * Ctotal)
    return Wcat, bcat


def build_kernel_params(p):
    wf, bf = inception_to_matmul(*p["filter"], NEW_DILATION, SEQ_LENGTH,
                                 RESIDUAL_CHANNELS, CONV_CHANNELS)
    wg, bg = inception_to_matmul(*p["gate"], NEW_DILATION, SEQ_LENGTH,
                                 RESIDUAL_CHANNELS, CONV_CHANNELS)
    ws, bs = conv1xk_to_matmul(*p["skip"], 1, SEQ_LENGTH)
    wr, br = conv1xk_to_matmul(*p["res"], 1, SEQ_LENGTH)
    # Fuse filter|gate and skip|res along the output (lane) dimension -> 2 wide matmuls.
    w_fg = np.concatenate([wf, wg], axis=1)          # (TCR, 2*TCC) = (128, 256)
    b_fg = np.concatenate([bf, bg], axis=1)          # (1, 256)
    w_sr = np.concatenate([ws, wr], axis=1)          # (TCC, TCS + TCR) = (128, 384)
    b_sr = np.concatenate([bs, br], axis=1)          # (1, 384)
    idx = np.arange(NUM_NODES)                       # LayerNormalization weight[:, idx, :]
    lw = np.transpose(p["ln_w"][:, idx, :], (1, 2, 0)).reshape(NUM_NODES, T_OUT * RESIDUAL_CHANNELS)
    lb = np.transpose(p["ln_b"][:, idx, :], (1, 2, 0)).reshape(NUM_NODES, T_OUT * RESIDUAL_CHANNELS)
    return dict(
        w_fg=jnp.asarray(w_fg, MXU_DTYPE),           # bf16 matmul weights (DMA-dominant)
        b_fg=jnp.asarray(b_fg, jnp.float32),
        w_sr=jnp.asarray(w_sr, MXU_DTYPE),
        b_sr=jnp.asarray(b_sr, jnp.float32),
        lw=jnp.asarray(lw, jnp.float32),
        lb=jnp.asarray(lb, jnp.float32))


# ---------------- layout helpers -----------------------------------------------
def nchw_to_kernel(x):    # (B, C, N, T) -> (B, N, T*C)
    B, C, N, T = x.shape
    return jnp.transpose(x, (0, 2, 3, 1)).reshape(B, N, T * C)


def kernel_to_nchw(x, C):  # (B, N, T*C) -> (B, C, N, T)
    B, N, TC = x.shape
    T = TC // C
    return jnp.transpose(x.reshape(B, N, T, C), (0, 3, 1, 2))


# ---------------- Pallas kernel -------------------------------------------------
def mtgnn_layer_kernel(x_ref, xs_ref, wfg_ref, bfg_ref, wsr_ref, bsr_ref,
                       lw_ref, lb_ref, ox_ref, os_ref):
    # One grid step == one sample: (NUM_NODES, T*C) activation blocks, VMEM-resident
    # weights, block-local LayerNorm.
    x = x_ref[...]                                                     # (N, TCR) f32
    # fused filter/gate dilated-inception convs: one (N, 2*TCC) MXU matmul (bf16 weights)
    fg = jnp.dot(x.astype(wfg_ref.dtype), wfg_ref[...],
                 preferred_element_type=jnp.float32) + bfg_ref[...]
    filt = jnp.tanh(fg[:, :TCC])                                       # f32 VPU/EUP (v5e-safe)
    gate = jax.nn.sigmoid(fg[:, TCC:])
    h = filt * gate                                                    # (N, TCC) f32
    # TODO(synk): F.dropout only implemented for training=False (identity).
    # fused skip conv + residual 1x1 conv: one (N, TCS+TCR) MXU matmul
    sr = jnp.dot(h.astype(wsr_ref.dtype), wsr_ref[...],
                 preferred_element_type=jnp.float32) + bsr_ref[...]
    # skip accumulation (output aliased onto the skip input buffer in HBM; the full
    # xs block is read before the aliased block is stored -> no RAW hazard per block)
    os_ref[...] = sr[:, :TCS] + xs_ref[...]
    # residual add (gcn_true=False path); trailing-T slice == full length here
    y = sr[:, TCS:] + x                                                # (N, TCR) f32
    # per-sample LayerNorm over (C, N, T): one-pass moments, var = E[y^2] - mu^2
    denom = 1.0 / float(NUM_NODES * TCR)
    mu = jnp.sum(y, keepdims=True) * denom                             # (1, 1)
    m2 = jnp.sum(y * y, keepdims=True) * denom
    var = m2 - mu * mu
    yn = (y - mu) * jax.lax.rsqrt(var + EPS)
    ox_ref[...] = yn * lw_ref[...] + lb_ref[...]


def mtgnn_layer_pallas(x_l, xs_l, kp):
    B, N, TCr = x_l.shape
    TCs = xs_l.shape[-1]
    # fold batch into the matmul M dimension: (B, N, T*C) -> (B*N, T*C)
    x2 = x_l.reshape(B * N, TCr)
    xs2 = xs_l.reshape(B * N, TCs)

    row_x = pl.BlockSpec((N, TCr), lambda b: (b, 0))                 # one sample per step
    row_s = pl.BlockSpec((N, TCs), lambda b: (b, 0))
    const = lambda shape: pl.BlockSpec(shape, lambda b: (0, 0))      # VMEM-resident weights

    ox2, os2 = pl.pallas_call(
        mtgnn_layer_kernel,
        grid=(B,),
        out_shape=(jax.ShapeDtypeStruct((B * N, TCr), jnp.float32),
                   jax.ShapeDtypeStruct((B * N, TCs), jnp.float32)),
        in_specs=[row_x, row_s,
                  const(kp["w_fg"].shape), const(kp["b_fg"].shape),
                  const(kp["w_sr"].shape), const(kp["b_sr"].shape),
                  const(kp["lw"].shape), const(kp["lb"].shape)],
        out_specs=(row_x, row_s),
        # P8: x -> layer-norm output buffer, skip-in -> skip-out buffer (donated).
        input_output_aliases={0: 0, 1: 1},
        compiler_params=pltpu.CompilerParams(dimension_semantics=("parallel",)),
        cost_estimate=pl.CostEstimate(flops=COST_FLOPS,
                                      transcendentals=COST_TRANSCENDENTALS,
                                      bytes_accessed=COST_BYTES),
    )(x2, xs2, kp["w_fg"], kp["b_fg"], kp["w_sr"], kp["b_sr"], kp["lw"], kp["lb"])
    return ox2.reshape(B, N, TCr), os2.reshape(B, N, TCs)


# ---------------- pure-JAX reference (NCHW, torch semantics) -------------------
def conv_same_1xk(x, W, b, dilation):
    k = W.shape[-1]
    total = dilation * (k - 1)
    padl = total // 2
    padr = total - padl
    xp = jnp.pad(x, ((0, 0), (0, 0), (0, 0), (padl, padr)))
    y = jax.lax.conv_general_dilated(
        xp, jnp.asarray(W), window_strides=(1, 1), padding="VALID",
        rhs_dilation=(1, dilation), dimension_numbers=("NCHW", "OIHW", "NCHW"))
    return y + jnp.asarray(b)[None, :, None, None]


def reference_forward(X, X_skip, p):
    def inception(Xin, Ws, Bs):
        outs = [conv_same_1xk(Xin, W, b, NEW_DILATION) for W, b in zip(Ws, Bs)]
        t_last = outs[-1].shape[-1]
        outs = [o[..., -t_last:] for o in outs]
        return jnp.concatenate(outs, axis=1)

    f = jnp.tanh(inception(X, *p["filter"]))
    g = jax.nn.sigmoid(inception(X, *p["gate"]))
    h = f * g
    skip = conv_same_1xk(h, *p["skip"], 1) + X_skip
    r = conv_same_1xk(h, *p["res"], 1)
    y = r + X[..., -r.shape[-1]:]
    mu = jnp.mean(y, axis=(1, 2, 3), keepdims=True)
    var = jnp.mean((y - mu) ** 2, axis=(1, 2, 3), keepdims=True)
    yn = (y - mu) / jnp.sqrt(var + EPS)
    idx = jnp.arange(NUM_NODES)
    w = jnp.asarray(p["ln_w"])[:, idx, :]
    bb = jnp.asarray(p["ln_b"])[:, idx, :]
    return yn * w[None] + bb[None], skip


# ---------------- main ----------------------------------------------------------
if __name__ == "__main__":
    key = jax.random.PRNGKey(0)
    kp_key, kx, ks = jax.random.split(key, 3)
    params = init_params(kp_key)
    kparams = build_kernel_params(params)

    # Native kernel layout is channels-last (B, N, T*C); a multi-layer MTGNN stack keeps
    # this layout end-to-end (no per-layer NCHW transposes / relayout ops).  The NCHW
    # copies below exist only to feed the pure-JAX reference for the correctness check.
    x_l = jax.random.normal(kx, (BATCH, NUM_NODES, TCR), jnp.float32)
    xs_l = jax.random.normal(ks, (BATCH, NUM_NODES, TCS), jnp.float32)
    X = kernel_to_nchw(x_l, RESIDUAL_CHANNELS)          # materialized before donation
    X_skip = kernel_to_nchw(xs_l, SKIP_CHANNELS)

    # x_l / xs_l are donated (aliased onto the outputs); they are not reused below.
    run = jax.jit(mtgnn_layer_pallas, donate_argnums=(0, 1))
    ox_l, os_l = run(x_l, xs_l, kparams)
    jax.block_until_ready((ox_l, os_l))

    ref_x, ref_skip = reference_forward(X, X_skip, params)
    ox = kernel_to_nchw(ox_l, RESIDUAL_CHANNELS)
    osk = kernel_to_nchw(os_l, SKIP_CHANNELS)
    tol = 3e-2 if USE_BF16_WEIGHTS else 1e-4            # bf16 weights vs f32 reference
    np.testing.assert_allclose(np.asarray(ox), np.asarray(ref_x), rtol=tol, atol=tol)
    np.testing.assert_allclose(np.asarray(osk), np.asarray(ref_skip), rtol=tol, atol=tol)
    print("KERNEL_OK")
</pallas_src>

<mosaic_0001>
module attributes {stable_mosaic.version = 11 : i64} {
  func.func @mtgnn_layer_kernel(%arg0: i32, %arg1: memref<8x128xf32, #tpu.memory_space<vmem>>, %arg2: memref<8x256xf32, #tpu.memory_space<vmem>>, %arg3: memref<128x256xbf16, #tpu.memory_space<vmem>>, %arg4: memref<1x256xf32, #tpu.memory_space<vmem>>, %arg5: memref<128x384xbf16, #tpu.memory_space<vmem>>, %arg6: memref<1x384xf32, #tpu.memory_space<vmem>>, %arg7: memref<8x128xf32, #tpu.memory_space<vmem>>, %arg8: memref<8x128xf32, #tpu.memory_space<vmem>>, %arg9: memref<8x128xf32, #tpu.memory_space<vmem>>, %arg10: memref<8x256xf32, #tpu.memory_space<vmem>>) attributes {dimension_semantics = [#tpu.dimension_semantics<parallel>], iteration_bounds = array<i64: 2>, scalar_prefetch = 0 : i64, scratch_operands = 0 : i64, tpu.core_type = #tpu.core_type<tc>, window_params = [{transform_indices = @transform_0, window_bounds = array<i64: 8, 128>}, {transform_indices = @transform_1, window_bounds = array<i64: 8, 256>}, {pipeline_mode = #tpu.pipeline_mode<synchronous>, transform_indices = @transform_2, window_bounds = array<i64: 128, 256>}, {pipeline_mode = #tpu.pipeline_mode<synchronous>, transform_indices = @transform_3, window_bounds = array<i64: 1, 256>}, {pipeline_mode = #tpu.pipeline_mode<synchronous>, transform_indices = @transform_4, window_bounds = array<i64: 128, 384>}, {pipeline_mode = #tpu.pipeline_mode<synchronous>, transform_indices = @transform_5, window_bounds = array<i64: 1, 384>}, {pipeline_mode = #tpu.pipeline_mode<synchronous>, transform_indices = @transform_6, window_bounds = array<i64: 8, 128>}, {pipeline_mode = #tpu.pipeline_mode<synchronous>, transform_indices = @transform_7, window_bounds = array<i64: 8, 128>}, {transform_indices = @transform_8, window_bounds = array<i64: 8, 128>}, {transform_indices = @transform_9, window_bounds = array<i64: 8, 256>}]} {
    %c0 = arith.constant 0 : index
    %c0_0 = arith.constant 0 : index
    %0 = vector.load %arg1[%c0, %c0_0] : memref<8x128xf32, #tpu.memory_space<vmem>>, vector<8x128xf32>
    %1 = arith.truncf %0 : vector<8x128xf32> to vector<8x128xbf16>
    %c0_1 = arith.constant 0 : index
    %c0_2 = arith.constant 0 : index
    %2 = vector.load %arg3[%c0_1, %c0_2] : memref<128x256xbf16, #tpu.memory_space<vmem>>, vector<128x256xbf16>
    %cst = arith.constant dense<0.000000e+00> : vector<8x256xf32>
    %3 = tpu.matmul %1, %2, %cst {dimension_numbers = #tpu.dot_dimension_numbers<[1], [0], [0], [1], [0, 0, 1, 1], [], []>} : vector<8x128xbf16>, vector<128x256xbf16>, vector<8x256xf32> -> vector<8x256xf32>
    %c0_3 = arith.constant 0 : index
    %c0_4 = arith.constant 0 : index
    %4 = vector.load %arg4[%c0_3, %c0_4] : memref<1x256xf32, #tpu.memory_space<vmem>>, vector<1x256xf32>
    %5 = vector.broadcast %4 : vector<1x256xf32> to vector<8x256xf32>
    %6 = arith.addf %3, %5 : vector<8x256xf32>
    %7 = vector.extract_strided_slice %6 {offsets = [0, 0], sizes = [8, 128], strides = [1, 1]} : vector<8x256xf32> to vector<8x128xf32>
    %8 = math.tanh %7 : vector<8x128xf32>
    %9 = vector.extract_strided_slice %6 {offsets = [0, 128], sizes = [8, 128], strides = [1, 1]} : vector<8x256xf32> to vector<8x128xf32>
    %10 = arith.negf %9 : vector<8x128xf32>
    %11 = math.exp %10 : vector<8x128xf32>
    %cst_5 = arith.constant 1.000000e+00 : f32
    %12 = vector.broadcast %cst_5 : f32 to vector<8x128xf32>
    %13 = arith.addf %12, %11 : vector<8x128xf32>
    %14 = arith.divf %12, %13 : vector<8x128xf32>
    %15 = arith.mulf %8, %14 : vector<8x128xf32>
    %16 = arith.truncf %15 : vector<8x128xf32> to vector<8x128xbf16>
    %c0_6 = arith.constant 0 : index
    %c0_7 = arith.constant 0 : index
    %17 = vector.load %arg5[%c0_6, %c0_7] : memref<128x384xbf16, #tpu.memory_space<vmem>>, vector<128x384xbf16>
    %cst_8 = arith.constant dense<0.000000e+00> : vector<8x384xf32>
    %18 = tpu.matmul %16, %17, %cst_8 {dimension_numbers = #tpu.dot_dimension_numbers<[1], [0], [0], [1], [0, 0, 1, 1], [], []>} : vector<8x128xbf16>, vector<128x384xbf16>, vector<8x384xf32> -> vector<8x384xf32>
    %c0_9 = arith.constant 0 : index
    %c0_10 = arith.constant 0 : index
    %19 = vector.load %arg6[%c0_9, %c0_10] : memref<1x384xf32, #tpu.memory_space<vmem>>, vector<1x384xf32>
    %20 = vector.broadcast %19 : vector<1x384xf32> to vector<8x384xf32>
    %21 = arith.addf %18, %20 : vector<8x384xf32>
    %22 = vector.extract_strided_slice %21 {offsets = [0, 0], sizes = [8, 256], strides = [1, 1]} : vector<8x384xf32> to vector<8x256xf32>
    %c0_11 = arith.constant 0 : index
    %c0_12 = arith.constant 0 : index
    %23 = vector.load %arg2[%c0_11, %c0_12] : memref<8x256xf32, #tpu.memory_space<vmem>>, vector<8x256xf32>
    %24 = arith.addf %22, %23 : vector<8x256xf32>
    %c0_13 = arith.constant 0 : index
    %c0_14 = arith.constant 0 : index
    %25 = vector.load %arg10[%c0_13, %c0_14] : memref<8x256xf32, #tpu.memory_space<vmem>>, vector<8x256xf32>
    tpu.vector_store %arg10[%c0_13, %c0_14], %24 {strides = array<i32>} : memref<8x256xf32, #tpu.memory_space<vmem>>, vector<8x256xf32>,
    %26 = vector.extract_strided_slice %21 {offsets = [0, 256], sizes = [8, 128], strides = [1, 1]} : vector<8x384xf32> to vector<8x128xf32>
    %27 = arith.addf %26, %0 : vector<8x128xf32>
    %28 = vector.shape_cast %27 : vector<8x128xf32> to vector<1x8x128xf32>
    %cst_15 = arith.constant dense<0.000000e+00> : vector<1xf32>
    %29 = vector.multi_reduction <add>, %28, %cst_15 [1, 2] : vector<1x8x128xf32> to vector<1xf32>
    %30 = vector.shape_cast %29 : vector<1xf32> to vector<1x1x1xf32>
    %31 = vector.extract %30[0, 0, 0] : f32 from vector<1x1x1xf32>
    %32 = vector.broadcast %31 : f32 to vector<1x1xf32>
    %cst_16 = arith.constant 9.765625E-4 : f32
    %33 = vector.broadcast %cst_16 : f32 to vector<1x1xf32>
    %34 = arith.mulf %32, %33 : vector<1x1xf32>
    %35 = arith.mulf %27, %27 : vector<8x128xf32>
    %36 = vector.shape_cast %35 : vector<8x128xf32> to vector<1x8x128xf32>
    %cst_17 = arith.constant dense<0.000000e+00> : vector<1xf32>
    %37 = vector.multi_reduction <add>, %36, %cst_17 [1, 2] : vector<1x8x128xf32> to vector<1xf32>
    %38 = vector.shape_cast %37 : vector<1xf32> to vector<1x1x1xf32>
    %39 = vector.extract %38[0, 0, 0] : f32 from vector<1x1x1xf32>
    %40 = vector.broadcast %39 : f32 to vector<1x1xf32>
    %cst_18 = arith.constant 9.765625E-4 : f32
    %41 = vector.broadcast %cst_18 : f32 to vector<1x1xf32>
    %42 = arith.mulf %40, %41 : vector<1x1xf32>
    %43 = arith.mulf %34, %34 : vector<1x1xf32>
    %44 = arith.subf %42, %43 : vector<1x1xf32>
    %45 = vector.broadcast %34 : vector<1x1xf32> to vector<8x128xf32>
    %46 = arith.subf %27, %45 : vector<8x128xf32>
    %cst_19 = arith.constant 9.99999974E-6 : f32
    %47 = vector.broadcast %cst_19 : f32 to vector<1x1xf32>
    %48 = arith.addf %44, %47 : vector<1x1xf32>
    %49 = math.rsqrt %48 : vector<1x1xf32>
    %50 = vector.broadcast %49 : vector<1x1xf32> to vector<8x128xf32>
    %51 = arith.mulf %46, %50 : vector<8x128xf32>
    %c0_20 = arith.constant 0 : index
    %c0_21 = arith.constant 0 : index
    %52 = vector.load %arg7[%c0_20, %c0_21] : memref<8x128xf32, #tpu.memory_space<vmem>>, vector<8x128xf32>
    %53 = arith.mulf %51, %52 : vector<8x128xf32>
    %c0_22 = arith.constant 0 : index
    %c0_23 = arith.constant 0 : index
    %54 = vector.load %arg8[%c0_22, %c0_23] : memref<8x128xf32, #tpu.memory_space<vmem>>, vector<8x128xf32>
    %55 = arith.addf %53, %54 : vector<8x128xf32>
    %c0_24 = arith.constant 0 : index
    %c0_25 = arith.constant 0 : index
    %56 = vector.load %arg9[%c0_24, %c0_25] : memref<8x128xf32, #tpu.memory_space<vmem>>, vector<8x128xf32>
    tpu.vector_store %arg9[%c0_24, %c0_25], %55 {strides = array<i32>} : memref<8x128xf32, #tpu.memory_space<vmem>>, vector<8x128xf32>,
    return
  }
  func.func @transform_0(%arg0: i32) -> (i32, i32) {
    %c0_i32 = arith.constant 0 : i32
    %c0_i32_0 = arith.constant 0 : i32
    return %arg0, %c0_i32 : i32, i32
  }
  func.func @transform_1(%arg0: i32) -> (i32, i32) {
    %c0_i32 = arith.constant 0 : i32
    %c0_i32_0 = arith.constant 0 : i32
    return %arg0, %c0_i32 : i32, i32
  }
  func.func @transform_2(%arg0: i32) -> (i32, i32) {
    %c0_i32 = arith.constant 0 : i32
    %c0_i32_0 = arith.constant 0 : i32
    %c0_i32_1 = arith.constant 0 : i32
    return %c0_i32, %c0_i32_0 : i32, i32
  }
  func.func @transform_3(%arg0: i32) -> (i32, i32) {
    %c0_i32 = arith.constant 0 : i32
    %c0_i32_0 = arith.constant 0 : i32
    %c0_i32_1 = arith.constant 0 : i32
    return %c0_i32, %c0_i32_0 : i32, i32
  }
  func.func @transform_4(%arg0: i32) -> (i32, i32) {
    %c0_i32 = arith.constant 0 : i32
    %c0_i32_0 = arith.constant 0 : i32
    %c0_i32_1 = arith.constant 0 : i32
    return %c0_i32, %c0_i32_0 : i32, i32
  }
  func.func @transform_5(%arg0: i32) -> (i32, i32) {
    %c0_i32 = arith.constant 0 : i32
    %c0_i32_0 = arith.constant 0 : i32
    %c0_i32_1 = arith.constant 0 : i32
    return %c0_i32, %c0_i32_0 : i32, i32
  }
  func.func @transform_6(%arg0: i32) -> (i32, i32) {
    %c0_i32 = arith.constant 0 : i32
    %c0_i32_0 = arith.constant 0 : i32
    %c0_i32_1 = arith.constant 0 : i32
    return %c0_i32, %c0_i32_0 : i32, i32
  }
  func.func @transform_7(%arg0: i32) -> (i32, i32) {
    %c0_i32 = arith.constant 0 : i32
    %c0_i32_0 = arith.constant 0 : i32
    %c0_i32_1 = arith.constant 0 : i32
    return %c0_i32, %c0_i32_0 : i32, i32
  }
  func.func @transform_8(%arg0: i32) -> (i32, i32) {
    %c0_i32 = arith.constant 0 : i32
    %c0_i32_0 = arith.constant 0 : i32
    return %arg0, %c0_i32 : i32, i32
  }
  func.func @transform_9(%arg0: i32) -> (i32, i32) {
    %c0_i32 = arith.constant 0 : i32
    %c0_i32_0 = arith.constant 0 : i32
    return %arg0, %c0_i32 : i32, i32
  }
}

</mosaic_0001>

<bundles_post_ra>
// kernel: mtgnn_layer_pallas.1
= control target key start
LH: loop header
LB: loop body
LE: loop exit
PB: predicated region body
PF: predicated region fallthrough
CT: control target
= control target key end

     0   :  { %s2013_s0 = inlined_call_operand.hbm [shape: f32[16,128], index: 0, kind: input, shape index: {}, may-alias: {0,8}]   ;;  %s2014_s1 = inlined_call_operand.hbm [shape: f32[16,256], index: 1, kind: input, shape index: {}, may-alias: {1,9}]   ;;  %s2015_s2 = inlined_call_operand.hbm [shape: bf16[128,256], index: 2, kind: input, shape index: {}]   ;;  %s2016_s3 = inlined_call_operand.vmem [shape: f32[1,256], index: 3, kind: input, shape index: {}]   ;;  %s2017_s4 = inlined_call_operand.hbm [shape: bf16[128,384], index: 4, kind: input, shape index: {}]   ;;  %s2018_s5 = inlined_call_operand.hbm [shape: f32[1,384], index: 5, kind: input, shape index: {}]   ;;  %s2019_s6 = inlined_call_operand.vmem [shape: f32[8,128], index: 6, kind: input, shape index: {}]   ;;  %s2020_s7 = inlined_call_operand.vmem [shape: f32[8,128], index: 7, kind: input, shape index: {}]   ;;  %s2021_s8 = inlined_call_operand.hbm [shape: f32[16,128], index: 8, kind: output, shape index: {0}, may-alias: {0,8}]   ;;  %s2022_s9 = inlined_call_operand.hbm [shape: f32[16,256], index: 9, kind: output, shape index: {1}, may-alias: {1,9}]  }
   0x1   :  { %2030 = sst [smem:[#allocation22_spill]] %s2013_s0 }
   0x2   :  { %2031 = sst [smem:[#allocation23_spill]] %s2015_s2 }
   0x3   :  { %2032 = sst [smem:[#allocation24_spill]] %s2021_s8 }
   0x4   :  { %15 = vsyncpa [#allocation3], 0 }
   0x5   :  { %17 = vsyncpa [#allocation3 + $0x1], 0 }
   0x6   :  { %18 = vsyncpa [#allocation6], 0 }
   0x7   :  { %20 = vsyncpa [#allocation6 + $0x1], 0 }
   0x8   :  { %21 = vsyncpa [#allocation9], 0 }
   0x9   :  { %22 = vsyncpa [#allocation4], 0 }
   0xa   :  { %24 = vsyncpa [#allocation4 + $0x1], 0 }
   0xb   :  { %25 = vsyncpa [#allocation13], 0 }
   0xc   :  { %27 = vsyncpa [#allocation13 + $0x1], 0  ;;  %s1664_s30 = smov 0   ;;  %s1666_s10 = smov 0  }
   0xd   :  { %s1668_s11 = smov 0   ;;  %s1670_s12 = smov 0  }
   0xe LB: > { %2033 = sst [smem:[#allocation20_spill]] %s1586_s30  ;;  %s1685_s13 = sadd.s32 4294967295, %s1598_s12   ;;  %s1598_s12 = sphi %s1670_s12, %s2060_s12   ;;  %s1594_s11 = sphi %s1668_s11, %s2059_s11   ;;  %s1590_s10 = sphi %s1666_s10, %s2058_s10   ;;  %s1586_s30 = sphi %s1664_s30, %s2057_s30  }
   0xf   : > { %s1084_s14 = sadd.s32 4294967294, %s1598_s12   ;;  %p53_p0 = scmp.ne.s32.totalorder %s1590_s10, %s1586_s30 }
  0x10   : > { %p2023_p1 = scmp.eq.s32.totalorder %s1685_s13, 0  ;;  %p235_p3 = scmp.eq.s32.totalorder %s1084_s14, 1 }
  0x11   : > { %p1085_p5 = scmp.ge.s32.totalorder %s1598_s12, 1  ;;  %p268_p7 = scmp.lt.s32.totalorder %s1598_s12, 3 }
  0x12   : > { %p1694_p4 = por %p2023_p1, %p53_p0  ;;  %p1699_p6 = por %p235_p3, %p53_p0 }
  0x13   : > { %p1704_p8 = pnand %p1085_p5, %p268_p7  ;;  %s1600_s18 = smov [#allocation7]  }
  0x14   : > { %s2034_s15 = scalar_select %p1694_p4, 1, 0 }
  0x15   : > { %s2035_s16 = scalar_select %p1699_p6, 1, 0 }
  0x16   : > { %s2037_s17 = scalar_select %p1704_p8, 1, 0 }
  0x17   : > { %2036 = sst [smem:[#allocation21_spill]] %s2035_s16  ;;  %s280_s19 = sshll.u32 %s1600_s18, 4  ;;  %s1708_s19 = int_to_ptr.vmem [resolvable:$true] %s280_s19 }
  0x18   : > { %p1206_p9 = pneg %p1704_p8  ;;  %s1601_s21 = smov [#allocation8]  }
  0x19   : > { %s296_s22 = sshll.u32 %s1601_s21, 4  ;;  %s2039_s2 = sld [smem:[#allocation23_spill]]  ;;  %s1719_s22 = int_to_ptr.vmem [resolvable:$true] %s296_s22 }
  0x1a   : > { %p1715_p11 = pnand %p1206_p9, %p2023_p1 }
  0x1c   : > { %p1729_p13 = pneg %p1715_p11 }
  0x1f   : > { %s1344_s25 = scalar_lea.hbm %s2039_s2, 2048 }
  0x20   : > { %p1345_p12 = scmp.ne.s32.totalorder %s2039_s2, %s1344_s25  ;;  %p1351_p5 = scmp.lt.u32.totalorder %s1344_s25, %s2039_s2 }
  0x22   : > { %p1347_p0 = pnand %p1729_p13, %p1345_p12 }
  0x24   : > { %p1348_p3 = pneg %p1347_p0 }
  0x26   : > { %p1353_p7 = pnand %p1351_p5, %p1348_p3 }
  0x28   : > { %1356 = shalt.err (!%p1353_p7)
}
  0x29   : > { %s1357_s18 = scalar_lea.vmem %s1708_s19, 2048  ;;  %p1365_p2 = scmp.lt.s32.totalorder %s1708_s19, %s1708_s19 }
  0x2a   : > { %p1358_p9 = scmp.ne.s32.totalorder %s1708_s19, %s1357_s18  ;;  %p1366_p6 = scmp.lt.s32.totalorder %s1357_s18, %s1357_s18 }
  0x2c   : > { %p1360_p10 = pnand %p1358_p9, %p1729_p13  ;;  %p1367_p12 = por %p1366_p6, %p1365_p2 }
  0x2e   : > { %p1361_p1 = pneg %p1360_p10 }
  0x30   : > { %p1368_p0 = pnand %p1367_p12, %p1361_p1 }
  0x32   : > { %1371 = shalt.err (!%p1368_p0)
}
  0x33   : > { %s1602_s21 = smov 128   ;;  %s1603_s23 = smov 8  }
  0x34   : > { %1209 = dma.hbm_to_vmem [thread:$0]  (!%p1715_p11), %s2039_s2, 2048, %s1708_s19, [#allocation6], %s1602_s21, %s1602_s21, %s1603_s23  }
  0x35   : > { %s1372_s29 = scalar_lea.hbm %s2017_s4, 3072 }
  0x36   : > { %p1373_p2 = scmp.ne.s32.totalorder %s2017_s4, %s1372_s29  ;;  %p1379_p10 = scmp.lt.u32.totalorder %s1372_s29, %s2017_s4 }
  0x38   : > { %p1375_p1 = pnand %p1373_p2, %p1729_p13 }
  0x3a   : > { %p1376_p6 = pneg %p1375_p1 }
  0x3c   : > { %p1381_p3 = pnand %p1379_p10, %p1376_p6 }
  0x3e   : > { %1384 = shalt.err (!%p1381_p3)
}
  0x3f   : > { %s1385_s19 = scalar_lea.vmem %s1719_s22, 3072  ;;  %p1393_p12 = scmp.lt.s32.totalorder %s1719_s22, %s1719_s22 }
  0x40   : > { %p1386_p5 = scmp.ne.s32.totalorder %s1719_s22, %s1385_s19  ;;  %p1394_p0 = scmp.lt.s32.totalorder %s1385_s19, %s1385_s19 }
  0x42   : > { %p1388_p7 = pnand %p1386_p5, %p1729_p13  ;;  %p1395_p2 = por %p1394_p0, %p1393_p12 }
  0x44   : > { %p1389_p9 = pneg %p1388_p7 }
  0x46   : > { %p1396_p1 = pnand %p1395_p2, %p1389_p9 }
  0x48   : > { %1399 = shalt.err (!%p1396_p1)
}
  0x49   : > { %s1604_s16 = smov 192   ;;  %s1605_s30 = smov 12  }
  0x4a   : > { %1212 = dma.hbm_to_vmem [thread:$0]  (!%p1715_p11), %s2017_s4, 3072, %s1719_s22, [#allocation9], %s1604_s16, %s1604_s16, %s1605_s30  }
  0x4b   : > { %s1606_s24 = smov [#allocation10]   ;;  %s1774_s26 = sadd.s32 1, %s1598_s12  }
  0x4c   : > { %s310_s25 = sshll.u32 %s1606_s24, 4  ;;  %s1400_s14 = scalar_lea.hbm %s2018_s5, 48  ;;  %s311_s25 = int_to_ptr.vmem [resolvable:$true] %s310_s25 }
  0x4d   : > { %p1401_p6 = scmp.ne.s32.totalorder %s2018_s5, %s1400_s14  ;;  %p1407_p5 = scmp.lt.u32.totalorder %s1400_s14, %s2018_s5 }
  0x4f   : > { %p1403_p10 = pnand %p1401_p6, %p1729_p13 }
  0x51   : > { %p1404_p3 = pneg %p1403_p10 }
  0x53   : > { %p1409_p7 = pnand %p1407_p5, %p1404_p3 }
  0x55   : > { %1412 = shalt.err (!%p1409_p7)
}
  0x56   : > { %s1413_s22 = scalar_lea.vmem %s311_s25, 48  ;;  %s1420_s16 = scalar_lea.vmem %s311_s25, 64 }
  0x57   : > { %p1414_p9 = scmp.ne.s32.totalorder %s311_s25, %s1413_s22  ;;  %p1421_p2 = scmp.lt.s32.totalorder %s311_s25, %s311_s25 }
  0x58   : > { %p1422_p1 = scmp.lt.s32.totalorder %s1420_s16, %s1413_s22 }
  0x59   : > { %p1416_p12 = pnand %p1414_p9, %p1729_p13 }
  0x5a   : > { %p1423_p4 = por %p1422_p1, %p1421_p2 }
  0x5b   : > { %p1417_p0 = pneg %p1416_p12 }
  0x5d   : > { %p1424_p8 = pnand %p1423_p4, %p1417_p0 }
  0x5f   : > { %1427 = shalt.err (!%p1424_p8)
}
  0x60   : > { %1215 = dma.hbm_to_vmem [thread:$0]  (!%p1715_p11), %s2018_s5, 48, %s311_s25, [#allocation9]  }
  0x61   : > { %s37_s2 = ssub.s32 %s1598_s12, %s1774_s26  ;;  %s40_s8 = sadd.s32 1, %s1594_s11 }
  0x62   : > { %p38_p4 = scmp.eq.s32.totalorder %s37_s2, 0  ;;  %p47_p8 = scmp.ne.s32.totalorder %s1594_s11, %s1590_s10 }
  0x63   : > { %p48_p13 = scmp.eq.s32.totalorder %s1598_s12, 0  ;;  %p1233_p6 = scmp.lt.s32.totalorder %s1598_s12, 2 }
  0x64   : > { %s1802_s20 = scalar_select %p38_p4, %s1594_s11, %s40_s8  }
  0x65   : > { %p49_p10 = por %p48_p13, %p47_p8  ;;  %p2041_p3 = scmp.eq.s32.totalorder %s1685_s13, 1 }
  0x66   : > { %s1811_s23 = sand.u32 1, %s1594_s11   ;;  %s1091_s24 = sshll.u32 %s1598_s12, 7 }
  0x67   : > { %p1806_p5 = por %p2041_p3, %p47_p8  ;;  %s1090_s25 = sshll.u32 %s1811_s23, 3 }
  0x68   : > { %s2043_s0 = sld [smem:[#allocation22_spill]]  ;;  %s331_s18 = scalar_lea.vmem [#allocation2], %s1090_s25 }
  0x69   : > { %s2042_s28 = scalar_select %p1806_p5, 1, 0 }
  0x6a   : > { %s338_s19 = sshll.u32 %s331_s18, 4  ;;  %p1820_p11 = pnand %p1233_p6, %p49_p10  ;;  %s1824_s19 = int_to_ptr.vmem [resolvable:$true] %s338_s19 }
  0x6b   : > { %s345_s16 = sand.u32 1, %s1598_s12   ;;  %s328_s30 = scalar_lea.sflag [#allocation3], %s1811_s23 }
  0x6c   : > { %p1430_p9 = pneg %p1820_p11 }
  0x6e   : > { %s1818_s14 = scalar_lea.hbm %s2043_s0, %s1091_s24  ;;  %s1433_s24 = scalar_lea.hbm %s2043_s0, 256 }
  0x6f   : > { %s1428_s21 = scalar_lea.hbm %s1818_s14, 128  ;;  %p1434_p2 = scmp.lt.u32.totalorder %s1818_s14, %s2043_s0 }
  0x70   : > { %p1429_p7 = scmp.ne.s32.totalorder %s1818_s14, %s1428_s21  ;;  %p1435_p1 = scmp.lt.u32.totalorder %s1433_s24, %s1428_s21 }
  0x71   : > { %p1437_p8 = scmp.lt.u32.totalorder %s1428_s21, %s1818_s14 }
  0x72   : > { %p1431_p12 = pnand %p1430_p9, %p1429_p7  ;;  %p1436_p4 = por %p1435_p1, %p1434_p2 }
  0x74   : > { %p1432_p0 = pneg %p1431_p12  ;;  %p1438_p13 = por %p1437_p8, %p1436_p4 }
  0x76   : > { %p1439_p6 = pnand %p1438_p13, %p1432_p0 }
  0x78   : > { %1442 = shalt.err (!%p1439_p6)
}
  0x79   : > { %s1443_s29 = scalar_lea.vmem %s1824_s19, 128  ;;  %s1607_s18 = smov [#allocation2]  }
  0x7a   : > { %p1444_p10 = scmp.ne.s32.totalorder %s1824_s19, %s1443_s29  ;;  %s1448_s2 = sshll.u32 %s1607_s18, 4  ;;  %s1449_s2 = int_to_ptr.vmem [resolvable:$false] %s1448_s2 }
  0x7b   : > { %s1450_s8 = scalar_lea.vmem %s1449_s2, 256  ;;  %p1451_p12 = scmp.lt.s32.totalorder %s1824_s19, %s1449_s2 }
  0x7c   : > { %p1446_p3 = pnand %p1444_p10, %p1430_p9  ;;  %p1452_p2 = scmp.lt.s32.totalorder %s1450_s8, %s1443_s29 }
  0x7e   : > { %p1447_p7 = pneg %p1446_p3  ;;  %p1453_p1 = por %p1452_p2, %p1451_p12 }
  0x80   : > { %p1454_p4 = pnand %p1453_p1, %p1447_p7 }
  0x82   : > { %1457 = shalt.err (!%p1454_p4)
}
  0x83   : > { %1219 = dma.hbm_to_vmem [thread:$0]  (!%p1820_p11), %s1818_s14, 128, %s1824_s19, %s328_s30  }
  0x84   : > { %s1092_s21 = sshll.u32 %s1811_s23, 4  ;;  %s1151_s24 = sshll.u32 %s1598_s12, 8 }
  0x85   : > { %s1858_s18 = scalar_lea.hbm %s2014_s1, %s1151_s24  ;;  %s349_s29 = scalar_lea.vmem [#allocation5], %s1092_s21 }
  0x86   : > { %s357_s2 = sshll.u32 %s349_s29, 4  ;;  %s346_s8 = scalar_lea.sflag [#allocation6], %s345_s16  ;;  %s358_s2 = int_to_ptr.vmem [resolvable:$true] %s357_s2 }
  0x87   : > { %s1458_s0 = scalar_lea.hbm %s1858_s18, 256  ;;  %s1463_s19 = scalar_lea.hbm %s2014_s1, 512 }
  0x88   : > { %p1459_p0 = scmp.ne.s32.totalorder %s1858_s18, %s1458_s0  ;;  %p1464_p6 = scmp.lt.u32.totalorder %s1858_s18, %s2014_s1 }
  0x89   : > { %p1465_p10 = scmp.lt.u32.totalorder %s1463_s19, %s1458_s0  ;;  %p1467_p7 = scmp.lt.u32.totalorder %s1458_s0, %s1858_s18 }
  0x8a   : > { %p1461_p8 = pnand %p1459_p0, %p1430_p9 }
  0x8b   : > { %p1466_p3 = por %p1465_p10, %p1464_p6 }
  0x8c   : > { %p1462_p13 = pneg %p1461_p8 }
  0x8d   : > { %p1468_p12 = por %p1467_p7, %p1466_p3 }
  0x8f   : > { %p1469_p2 = pnand %p1468_p12, %p1462_p13 }
  0x91   : > { %1472 = shalt.err (!%p1469_p2)
}
  0x92   : > { %s1473_s16 = scalar_lea.vmem %s358_s2, 256  ;;  %s1608_s21 = smov [#allocation5]  }
  0x93   : > { %p1474_p1 = scmp.ne.s32.totalorder %s358_s2, %s1473_s16  ;;  %s1478_s25 = sshll.u32 %s1608_s21, 4  ;;  %s1479_s25 = int_to_ptr.vmem [resolvable:$false] %s1478_s25 }
  0x94   : > { %s1480_s27 = scalar_lea.vmem %s1479_s25, 512  ;;  %p1481_p8 = scmp.lt.s32.totalorder %s358_s2, %s1479_s25 }
  0x95   : > { %p1476_p4 = pnand %p1474_p1, %p1430_p9  ;;  %p1482_p5 = scmp.lt.s32.totalorder %s1480_s27, %s1473_s16 }
  0x97   : > { %p1477_p0 = pneg %p1476_p4  ;;  %p1483_p6 = por %p1482_p5, %p1481_p8 }
  0x99   : > { %p1484_p10 = pnand %p1483_p6, %p1477_p0 }
  0x9b   : > { %1487 = shalt.err (!%p1484_p10)
}
  0x9c   : > { %1222 = dma.hbm_to_vmem [thread:$0]  (!%p1820_p11), %s1858_s18, 256, %s358_s2, %s346_s8  }
  0x9d   : > { %p2045_p13 = scmp.ne.s32.totalorder %s2037_s17, 0 }
  0x9e   : > { %s1884_s0 = sand.u32 (!%p2045_p13), 1, %s1590_s10   ;;  %p2046_p5 = scmp.ne.s32.totalorder (!%p2045_p13), %s2034_s15, 0 }
  0x9f   : > { %366 = sbr.rel (%p2045_p13) target bundleno = 918 (0x396), region = 52  ;;  %s1096_s29 = sshll.u32 (!%p2045_p13), %s1884_s0, 3 }
  0xa0   : > { %s369_s23 = scalar_lea.sflag (!%p2045_p13), [#allocation3], %s1884_s0  ;;  %s1890_s14 = scalar_lea.vmem (!%p2045_p13), [#allocation2], %s1096_s29 }
  0xa6   : > { %1561 = dma.done.wait (%p2046_p5), %s369_s23, 128  }
  0xa7   : > { %1563 = vsyncadd (%p2046_p5), %s369_s23, 4294967168  ;;  %s377_s17 = sand.u32 1, %s1685_s13   ;;  %s1097_s22 = sshll.u32 %s1884_s0, 4 }
  0xa8   : > { %s378_s18 = scalar_lea.sflag [#allocation6], %s377_s17  ;;  %s1900_s2 = scalar_lea.vmem [#allocation5], %s1097_s22 }
  0xa9   : > { %1565 = dma.done.wait (%p2046_p5), %s378_s18, 256  }
  0xaa   : > { %1567 = vsyncadd (%p2046_p5), %s378_s18, 4294967040  ;;  %p2047_p11 = scmp.eq.s32.totalorder %s1685_s13, 0 }
  0xac   : > { %1569 = dma.done.wait (%p2047_p11), [#allocation6], 2048   ;;  %p2048_p9 = pmov %p2047_p11 }
  0xae   : > { %1571 = vsyncadd (%p2048_p9), [#allocation6], 4294965248  ;;  %p2049_p3 = pmov %p2048_p9 }
  0xb0   : > { %1573 = dma.done.wait (%p2049_p3), [#allocation9], 3120   ;;  %p2050_p7 = pmov %p2049_p3 }
  0xb1   : > { %v1609_v0 = vmov 0   ;;  %v1280_v1 = vld [vmem:[#allocation7 + $0x4] ss:$8 sps:$4 sm:$0xff]   ;;  %v1282_v2 = vld [vmem:[#allocation7] ss:$8 sps:$4 sm:$0xff]   ;;  %v1915_v17 = vld [vmem:[%s1890_s14] sm:$0xff]  ;;  %v459_v44 = vlaneseq }
  0xb2   : > { %1575 = vsyncadd (%p2050_p7), [#allocation9], 4294964176  ;;  %581 = vmatprep.mubr.bf16.mxu0 %v1609_v0  ;;  %808 = vmatprep.mubr.bf16.mxu1 %v1609_v0  ;;  %v1283_v3 = vld [vmem:[#allocation7 + $0x14] ss:$8 sps:$4 sm:$0xff]   ;;  %v1285_v4 = vld [vmem:[#allocation7 + $0x10] ss:$8 sps:$4 sm:$0xff]   ;;  %v440_v18 = vpack.c.bf16 %v1915_v17, %v1915_v17 }
  0xb3   : > { %549 = vmatprep.subr.bf16.mxu0 %v1280_v1  ;;  %v1286_v5 = vld [vmem:[#allocation7 + $0x24] ss:$8 sps:$4 sm:$0xff]   ;;  %v1288_v6 = vld [vmem:[#allocation7 + $0x20] ss:$8 sps:$4 sm:$0xff]   ;;  %v1289_v7 = vld [vmem:[#allocation7 + $0x34] ss:$8 sps:$4 sm:$0xff]  }
  0xb4   : > { %550 = vmatpush1.bf16.msra.mxu0 %v1282_v2  ;;  %v1291_v8 = vld [vmem:[#allocation7 + $0x30] ss:$8 sps:$4 sm:$0xff]   ;;  %v1292_v9 = vld [vmem:[#allocation7 + $0x44] ss:$8 sps:$4 sm:$0xff]   ;;  %v1294_v10 = vld [vmem:[#allocation7 + $0x40] ss:$8 sps:$4 sm:$0xff]  }
  0xb5   : > { %551 = vmatprep.subr.bf16.mxu0 %v1283_v3  ;;  %v1295_v11 = vld [vmem:[#allocation7 + $0x54] ss:$8 sps:$4 sm:$0xff]   ;;  %v1297_v12 = vld [vmem:[#allocation7 + $0x50] ss:$8 sps:$4 sm:$0xff]   ;;  %v1298_v13 = vld [vmem:[#allocation7 + $0x64] ss:$8 sps:$4 sm:$0xff]  }
  0xb6   : > { %v1300_v14 = vld [vmem:[#allocation7 + $0x60] ss:$8 sps:$4 sm:$0xff]   ;;  %v1301_v15 = vld [vmem:[#allocation7 + $0x74] ss:$8 sps:$4 sm:$0xff]   ;;  %v1303_v16 = vld [vmem:[#allocation7 + $0x70] ss:$8 sps:$4 sm:$0xff]  }
  0xb7   : > { %v1304_v19 = vld [vmem:[#allocation8 + $0x4] ss:$12 sps:$4 sm:$0xff]   ;;  %v1306_v20 = vld [vmem:[#allocation8] ss:$12 sps:$4 sm:$0xff]   ;;  %v1307_v21 = vld [vmem:[#allocation8 + $0x8] ss:$12 sps:$4 sm:$0xff]  }
  0xb8   : > { %552 = vmatpush1.bf16.msra.mxu0 %v1285_v4  ;;  %776 = vmatprep.subr.bf16.mxu1 %v1304_v19  ;;  %v1610_v22 = vmov 0.0   ;;  %v1308_v23 = vld [vmem:[#allocation8 + $0x1c] ss:$12 sps:$4 sm:$0xff]   ;;  %v1310_v24 = vld [vmem:[#allocation8 + $0x18] ss:$12 sps:$4 sm:$0xff]   ;;  %vm1611_vm0 = vmmov 0  }
  0xb9   : > { %553 = vmatprep.subr.bf16.mxu0 %v1286_v5  ;;  %777 = vmatpush1.bf16.msra.mxu1 %v1306_v20  ;;  %v1311_v25 = vld [vmem:[#allocation8 + $0x20] ss:$12 sps:$4 sm:$0xff]   ;;  %v1314_v27 = vld [vmem:[#allocation8 + $0x30] ss:$12 sps:$4 sm:$0xff]   ;;  %v1315_v28 = vld [vmem:[#allocation8 + $0x38] ss:$12 sps:$4 sm:$0xff]  }
  0xba   : > { %778 = vmatprep.subr.bf16.mxu1 %v1308_v23  ;;  %v1312_v26 = vld [vmem:[#allocation8 + $0x34] ss:$12 sps:$4 sm:$0xff]   ;;  %v1316_v29 = vld [vmem:[#allocation8 + $0x4c] ss:$12 sps:$4 sm:$0xff]   ;;  %v1319_v31 = vld [vmem:[#allocation8 + $0x50] ss:$12 sps:$4 sm:$0xff]  }
  0xbb   : > { %v1318_v30 = vld [vmem:[#allocation8 + $0x48] ss:$12 sps:$4 sm:$0xff]   ;;  %v1320_v32 = vld [vmem:[#allocation8 + $0x64] ss:$12 sps:$4 sm:$0xff]   ;;  %v1322_v33 = vld [vmem:[#allocation8 + $0x60] ss:$12 sps:$4 sm:$0xff]  }
  0xbc   : > { %554 = vmatpush1.bf16.msra.mxu0 %v1288_v6  ;;  %v1323_v34 = vld [vmem:[#allocation8 + $0x68] ss:$12 sps:$4 sm:$0xff]   ;;  %v1326_v36 = vld [vmem:[#allocation8 + $0x78] ss:$12 sps:$4 sm:$0xff]   ;;  %v1327_v37 = vld [vmem:[#allocation8 + $0x80] ss:$12 sps:$4 sm:$0xff]  }
  0xbd   : > { %555 = vmatprep.subr.bf16.mxu0 %v1289_v7  ;;  %779 = vmatpush1.bf16.msra.mxu1 %v1310_v24  ;;  %v1324_v35 = vld [vmem:[#allocation8 + $0x7c] ss:$12 sps:$4 sm:$0xff]   ;;  %v1328_v38 = vld [vmem:[#allocation8 + $0x94] ss:$12 sps:$4 sm:$0xff]   ;;  %v1331_v40 = vld [vmem:[#allocation8 + $0x98] ss:$12 sps:$4 sm:$0xff]  }
  0xbe   : > { %780 = vmatprep.subr.bf16.mxu1 %v1312_v26  ;;  %v1330_v39 = vld [vmem:[#allocation8 + $0x90] ss:$12 sps:$4 sm:$0xff]   ;;  %v1332_v41 = vld [vmem:[#allocation8 + $0xac] ss:$12 sps:$4 sm:$0xff]   ;;  %v1334_v42 = vld [vmem:[#allocation8 + $0xa8] ss:$12 sps:$4 sm:$0xff]  }
  0xbf   : > { %v1335_v43 = vld [vmem:[#allocation8 + $0xb0] ss:$12 sps:$4 sm:$0xff]   ;;  %v460_v45 = vshrl.u32 %v459_v44, 7  ;;  %v631_v1 = vld [vmem:[#allocation10] sm:$0x7]  ;;  %s437_s19 = scalar_lea.vmem [#allocation12], %s1097_s22 }
  0xc0   : > { %556 = vmatpush1.bf16.msra.mxu0 %v1291_v8  ;;  %v457_v47 = vld [vmem:[%s2016_s3] sm:$0x3]  ;;  %s1152_s30 = sshll.u32 %s1685_s13, 8  ;;  %s931_s24 = sshll.u32 %s437_s19, 4  ;;  %s932_s24 = int_to_ptr.vmem [resolvable:$true] %s931_s24 }
  0xc1   : > { %557 = vmatprep.subr.bf16.mxu0 %v1292_v9  ;;  %781 = vmatpush1.bf16.msra.mxu1 %v1314_v27  ;;  %v465_v46 = vsub.s32 1, %v460_v45  ;;  %v461_v55 = vsub.s32 0, %v460_v45  ;;  %v643_v0 = vsub.s32 2, %v460_v45  ;;  %v857_v6 = vld [vmem:[%s1900_s2] sm:$0xff]  ;;  %s1936_s25 = scalar_lea.hbm %s2022_s9, %s1152_s30  ;;  %s904_s27 = scalar_lea.sflag [#allocation13], %s1884_s0 }
  0xc2   : > { %782 = vmatprep.subr.bf16.mxu1 %v1316_v29  ;;  %s1488_s23 = scalar_lea.vmem %s932_s24, 256  ;;  %p2051_p2 = scmp.ne.s32.totalorder %s2042_s28, 0 }
  0xc3   : > { %v466_v48 = vrot.slane %v457_v47, %v465_v46  ;;  %v462_v56 = vrot.slane %v457_v47, %v461_v55  ;;  %v636_v2 = vrot.slane %v631_v1, %v461_v55  ;;  %v644_v3 = vrot.slane %v631_v1, %v643_v0  ;;  %p1489_p12 = scmp.ne.s32.totalorder %s932_s24, %s1488_s23  ;;  %s1612_s14 = smov [#allocation12]  }
  0xc4   : > { %558 = vmatpush1.bf16.msra.mxu0 %v1294_v10  ;;  %v640_v4 = vrot.slane %v631_v1, %v465_v46  ;;  %s1492_s17 = sshll.u32 %s1612_s14, 4  ;;  %s1493_s17 = int_to_ptr.vmem [resolvable:$false] %s1492_s17 }
  0xc5   : > { %559 = vmatprep.subr.bf16.mxu0 %v1295_v11  ;;  %783 = vmatpush1.bf16.msra.mxu1 %v1318_v30  ;;  %v858_v11 = vld [vmem:[%s1900_s2 + $0x8] sm:$0xff]  ;;  %p1490_p1 = pnand %p1489_p12, %p2051_p2  ;;  %s1494_s22 = scalar_lea.vmem %s1493_s17, 512 }
  0xc6   : > { %784 = vmatprep.subr.bf16.mxu1 %v1320_v32  ;;  %p1495_p0 = scmp.lt.s32.totalorder %s932_s24, %s1493_s17  ;;  %p1496_p8 = scmp.lt.s32.totalorder %s1494_s22, %s1488_s23 }
  0xc7   : > { %p1491_p4 = pneg %p1490_p1 }
  0xc8   : > { %560 = vmatpush1.bf16.msra.mxu0 %v1297_v12  ;;  %p1497_p6 = por %p1496_p8, %p1495_p0 }
  0xc9   : > { %561 = vmatprep.subr.bf16.mxu0 %v1298_v13  ;;  %785 = vmatpush1.bf16.msra.mxu1 %v1322_v33 }
  0xca   : > { %786 = vmatprep.subr.bf16.mxu1 %v1324_v35  ;;  %p1498_p10 = pnand %p1497_p6, %p1491_p4 }
  0xcc   : > { %562 = vmatpush1.bf16.msra.mxu0 %v1300_v14 }
  0xcd   : > { %563 = vmatprep.subr.bf16.mxu0 %v1301_v15  ;;  %787 = vmatpush1.bf16.msra.mxu1 %v1326_v36 }
  0xce   : > { %788 = vmatprep.subr.bf16.mxu1 %v1328_v38 }
  0xd0   : > { %564 = vmatpush1.bf16.msra.mxu0 %v1303_v16 }
  0xd1   : > { %1162 = vmatprep.subr.bf16.mxu0 %v1610_v22  ;;  %789 = vmatpush1.bf16.msra.mxu1 %v1330_v39 }
  0xd2   : > { %790 = vmatprep.subr.bf16.mxu1 %v1332_v41 }
  0xd3   : > { %582 = vmatmul.mubr.bf16.vlgmr.msra.gmra.mrb[0].mxu0 %v440_v18 }
  0xd4   : > { %1163 = vmatpush3.bf16.msra.mxu0 %v1307_v21  ;;  %1178 = vmatprep.mubr.msk.bf16.mxu0 %vm1611_vm0, %v1610_v22 }
  0xd5   : > { %1164 = vmatprep.subr.bf16.mxu0 %v1610_v22  ;;  %791 = vmatpush1.bf16.msra.mxu1 %v1334_v42 }
  0xd8   : > { %1165 = vmatpush3.bf16.msra.mxu0 %v1311_v25 }
  0xd9   : > { %1166 = vmatprep.subr.bf16.mxu0 %v1610_v22 }
  0xdc   : > { %1167 = vmatpush3.bf16.msra.mxu0 %v1315_v28 }
  0xdd   : > { %1168 = vmatprep.subr.bf16.mxu0 %v1610_v22 }
  0xe0   : > { %1169 = vmatpush3.bf16.msra.mxu0 %v1319_v31 }
  0xe1   : > { %1170 = vmatprep.subr.bf16.mxu0 %v1610_v22 }
  0xe4   : > { %1171 = vmatpush3.bf16.msra.mxu0 %v1323_v34 }
  0xe5   : > { %1172 = vmatprep.subr.bf16.mxu0 %v1610_v22 }
  0xe8   : > { %1173 = vmatpush3.bf16.msra.mxu0 %v1327_v37 }
  0xe9   : > { %1174 = vmatprep.subr.bf16.mxu0 %v1610_v22 }
  0xec   : > { %1175 = vmatpush3.bf16.msra.mxu0 %v1331_v40 }
  0xed   : > { %1176 = vmatprep.subr.bf16.mxu0 %v1610_v22 }
  0xf0   : > { %1177 = vmatpush3.bf16.msra.mxu0 %v1335_v43 }
 0x1a6   : > { %v583_v49 = vpop.f32.mrb[0].mxu0 }
 0x1a7   : > { %v585_v50 = vpop.f32.mrb[1].mxu0  ;;  %v584_v57 = vadd.f32 %v583_v49, %v462_v56 }
 0x1a8   : > { %v586_v51 = vadd.f32 %v585_v50, %v466_v48  ;;  %v587_v52 = vpop.f32.mrb[2].mxu0 }
 0x1a9   : > { %v588_v53 = vpop.f32.mrb[3].mxu0 }
 0x1aa   : > { %v1119_v54 = vmul.f32 -1.442695, %v586_v51 }
 0x1ac   : > { %1336 = vpow2.f32 %v1119_v54 }
 0x1ad   : > { %1338 = vtanh.f32 %v584_v57 }
 0x1b6   : > { %v1337_v58 = vpop.eup %1336 }
 0x1b7   : > { %v594_v59 = vadd.f32 1.0, %v1337_v58  ;;  %v1339_v60 = vpop.eup %1338 }
 0x1b9   : > { %1340 = vrcp.f32 %v594_v59 }
 0x1c3   : > { %v1341_v61 = vpop.eup %1340 }
 0x1c4   : > { %v597_v62 = vmul.f32 %v1341_v61, %v1339_v60 }
 0x1c6   : > { %v598_v63 = vpack.c.bf16 %v597_v62, %v597_v62 }
 0x1c8   : > { %809 = vmatmul.mubr.bf16.vlgmr.msra.gmra.mrb[0].mxu1 %v598_v63  ;;  %1179 = vmatmul.mubr.bf16.vlgmr.msra.gmra.mrb[4].mxu0 %v598_v63 }
 0x29b   : > { %v810_v5 = vpop.f32.mrb[0].mxu1  ;;  %v851_v7 = vpop.f32.mrb[4].mxu0 }
 0x29c   : > { %v811_v8 = vadd.f32 %v810_v5, %v636_v2  ;;  %v852_v9 = vadd.f32 %v851_v7, %v644_v3  ;;  %v812_v10 = vpop.f32.mrb[1].mxu1  ;;  %v1180_v12 = vpop.f32.mrb[5].mxu0 }
 0x29d   : > { %v813_v13 = vadd.f32 %v812_v10, %v640_v4  ;;  %v814_v14 = vpop.f32.mrb[2].mxu1  ;;  %v854_v15 = vpop.f32.mrb[6].mxu0 }
 0x29e   : > { %v859_v16 = vadd.f32 %v857_v6, %v811_v8  ;;  %v1925_v18 = vadd.f32 %v852_v9, %v1915_v17  ;;  %v815_v19 = vpop.f32.mrb[3].mxu1  ;;  %v1181_v20 = vpop.f32.mrb[7].mxu0 }
 0x29f   : > { %v860_v21 = vadd.f32 %v858_v11, %v813_v13 }
 0x2a0   : > { %861 = vst [vmem:[%s437_s19] sm:$0xff] %v859_v16  ;;  %864 = vadd.xlane.f32.xlu0 %v1925_v18  ;;  %v875_v22 = vmul.f32 %v1925_v18, %v1925_v18 }
 0x2a1   : > { %862 = vst [vmem:[%s437_s19 + $0x8] sm:$0xff] %v860_v21 }
 0x2a4   : > { %876 = vadd.xlane.f32.xlu0 %v875_v22 }
 0x2a5   : > { %1501 = shalt.err (!%p1498_p10)
}
 0x2a6   : > { %s1502_s18 = scalar_lea.hbm %s1936_s25, 256  ;;  %s1506_s8 = scalar_lea.hbm %s2022_s9, 512 }
 0x2a7   : > { %p1503_p13 = scmp.ne.s32.totalorder %s1936_s25, %s1502_s18  ;;  %p1507_p9 = scmp.lt.u32.totalorder %s1936_s25, %s2022_s9 }
 0x2a8   : > { %p1508_p3 = scmp.lt.u32.totalorder %s1506_s8, %s1502_s18  ;;  %p1510_p12 = scmp.lt.u32.totalorder %s1502_s18, %s1936_s25 }
 0x2a9   : > { %p1504_p5 = pnand %p1503_p13, %p2051_p2 }
 0x2aa   : > { %p1509_p7 = por %p1508_p3, %p1507_p9 }
 0x2ab   : > { %p1505_p11 = pneg %p1504_p5 }
 0x2ac   : > { %p1511_p1 = por %p1510_p12, %p1509_p7 }
 0x2ae   : > { %p1512_p4 = pnand %p1511_p1, %p1505_p11 }
 0x2b0   : > { %1515 = shalt.err (!%p1512_p4)
}
 0x2b1   : > { %1203 = dma.vmem_to_hbm [thread:$0]  (%p2051_p2), %s932_s24, 256, %s1936_s25, %s904_s27   ;;  %v893_v45 = vld [vmem:[%s2019_s6] sm:$0xff] }
 0x2b2   : > { %v895_v47 = vld [vmem:[%s2020_s7] sm:$0xff]  ;;  %s1146_s14 = sshll.u32 %s1685_s13, 7  ;;  %s430_s17 = scalar_lea.vmem [#allocation11], %s1096_s29 }
 0x2b3   : > { %s917_s22 = sshll.u32 %s430_s17, 4  ;;  %s2052_s15 = sld [smem:[#allocation24_spill]]  ;;  %s1971_s22 = int_to_ptr.vmem [resolvable:$true] %s917_s22 }
 0x2b4   : > { %s899_s19 = scalar_lea.sflag [#allocation4], %s1884_s0  ;;  %s1516_s30 = scalar_lea.vmem %s1971_s22, 128 }
 0x2b5   : > { %p1517_p0 = scmp.ne.s32.totalorder %s1971_s22, %s1516_s30  ;;  %s1613_s13 = smov [#allocation11]  }
 0x2b6   : > { %s1520_s29 = sshll.u32 %s1613_s13, 4  ;;  %s1521_s29 = int_to_ptr.vmem [resolvable:$false] %s1520_s29 }
 0x2b7   : > { %p1518_p8 = pnand %p1517_p0, %p2051_p2  ;;  %p1523_p10 = scmp.lt.s32.totalorder %s1971_s22, %s1521_s29 }
 0x2b9   : > { %s1969_s8 = scalar_lea.hbm %s2052_s15, %s1146_s14  ;;  %p1519_p6 = pneg %p1518_p8 }
 0x32d   : > { %v865_v17 = vpop.xlane.xlu0 %864 }
 0x32e   : > { %v866_v23 = vrot.slane %v865_v17, 4 }
 0x330   : > { %v867_v24 = vadd.f32 %v866_v23, %v865_v17 }
 0x331   : > { %v877_v25 = vpop.xlane.xlu0 %876 }
 0x332   : > { %v868_v26 = vrot.slane %v867_v24, 2  ;;  %v878_v27 = vrot.slane %v877_v25, 4 }
 0x334   : > { %v879_v28 = vadd.f32 %v878_v27, %v877_v25  ;;  %v869_v29 = vadd.f32 %v868_v26, %v867_v24 }
 0x336   : > { %v880_v30 = vrot.slane %v879_v28, 2  ;;  %v870_v31 = vrot.slane %v869_v29, 1 }
 0x338   : > { %v881_v32 = vadd.f32 %v880_v30, %v879_v28  ;;  %v871_v33 = vadd.f32 %v870_v31, %v869_v29 }
 0x33a   : > { %1182 = vpush %v871_v33  ;;  %v882_v34 = vrot.slane %v881_v32, 1 }
 0x33c   : > { %v883_v35 = vadd.f32 %v882_v34, %v881_v32 }
 0x33e   : > { %1184 = vpush %v883_v35 }
 0x36b   : > { %s1183_s16 = spop %1182 }
 0x36c   : > { %v873_v36 = vstv %s1183_s16  ;;  %s1522_s16 = scalar_lea.vmem %s1521_s29, 256 }
 0x36d   : > { %v874_v37 = vmul.f32 0.0009765625, %v873_v36  ;;  %p1524_p13 = scmp.lt.s32.totalorder %s1522_s16, %s1516_s30 }
 0x36f   : > { %s1185_s24 = spop %1184  ;;  %v887_v39 = vmul.f32 %v874_v37, %v874_v37  ;;  %v889_v43 = vsub.f32 %v1925_v18, %v874_v37  ;;  %p1525_p5 = por %p1524_p13, %p1523_p10 }
 0x370   : > { %v885_v38 = vstv %s1185_s24 }
 0x371   : > { %v886_v40 = vmul.f32 0.0009765625, %v885_v38  ;;  %p1526_p11 = pnand %p1525_p5, %p1519_p6 }
 0x373   : > { %v888_v41 = vsub.f32 %v886_v40, %v887_v39 }
 0x375   : > { %v890_v42 = vadd.f32 1e-05, %v888_v41 }
 0x377   : > { %1342 = vrsqrt.f32 %v890_v42 }
 0x381   : > { %v1343_v44 = vpop.eup %1342 }
 0x382   : > { %v892_v46 = vmul.f32 %v1343_v44, %v889_v43 }
 0x384   : > { %v894_v48 = vmul.f32 %v893_v45, %v892_v46 }
 0x386   : > { %v896_v49 = vadd.f32 %v895_v47, %v894_v48 }
 0x388   : > { %897 = vst [vmem:[%s430_s17] sm:$0xff] %v896_v49 }
 0x389   : > { %1529 = shalt.err (!%p1526_p11)
}
 0x38a   : > { %s1530_s0 = scalar_lea.hbm %s1969_s8, 128  ;;  %s1534_s25 = scalar_lea.hbm %s2052_s15, 256 }
 0x38b   : > { %p1531_p9 = scmp.ne.s32.totalorder %s1969_s8, %s1530_s0  ;;  %p1535_p12 = scmp.lt.u32.totalorder %s1969_s8, %s2052_s15 }
 0x38c   : > { %p1536_p1 = scmp.lt.u32.totalorder %s1534_s25, %s1530_s0  ;;  %p1538_p0 = scmp.lt.u32.totalorder %s1530_s0, %s1969_s8 }
 0x38d   : > { %p1532_p3 = pnand %p1531_p9, %p2051_p2 }
 0x38e   : > { %p1537_p4 = por %p1536_p1, %p1535_p12 }
 0x38f   : > { %p1533_p7 = pneg %p1532_p3 }
 0x390   : > { %p1539_p8 = por %p1538_p0, %p1537_p4 }
 0x392   : > { %p1540_p6 = pnand %p1539_p8, %p1533_p7 }
 0x394   : > { %1543 = shalt.err (!%p1540_p6)
}
 0x395   : > { %1202 = dma.vmem_to_hbm [thread:$0]  (%p2051_p2), %s1971_s22, 128, %s1969_s8, %s899_s19  }
 0x396 PF: > { %s2053_s14 = sld [smem:[#allocation20_spill]]  ;;  %s2054_s17 = sld [smem:[#allocation21_spill]] }
 0x397   : > { %p2056_p13 = scmp.ge.s32.totalorder %s1598_s12, 2 }
 0x39c   : > { %s943_s18 = sand.u32 1, %s2053_s14   ;;  %p2055_p10 = scmp.ne.s32.totalorder %s2054_s17, 0 }
 0x39d   : > { %s944_s2 = scalar_lea.sflag [#allocation4], %s943_s18 }
 0x39e   : > { %p1224_p5 = pnand %p2056_p13, %p2055_p10 }
 0x3a0   : > { %1577 = dma.done.wait (!%p1224_p5), %s944_s2, 128  }
 0x3a1   : > { %1579 = vsyncadd (!%p1224_p5), %s944_s2, 4294967168  ;;  %s953_s30 = scalar_lea.sflag [#allocation13], %s943_s18 }
 0x3a2   : > { %1581 = dma.done.wait (!%p1224_p5), %s953_s30, 256  }
 0x3a3   : > { %1583 = vsyncadd (!%p1224_p5), %s953_s30, 4294967040  ;;  %p30_p2 = scmp.ge.s32.totalorder %s1774_s26, 4   ;;  %s2057_s30 = smov %s1590_s10 }
 0x3a4   : > { %s2058_s10 = smov %s1594_s11  ;;  %s2059_s11 = smov %s1802_s20 }
 0x3a5   : > { %s2060_s12 = smov %s1774_s26  ;;  %32 = sbr.rel (!%p30_p2) target bundleno = 14 (0xe), region = 139 }
 0x3ac   :  { %958 = vsyncpa [#allocation3], 1 }
 0x3ad   :  { %960 = vsyncpa [#allocation3 + $0x1], 1 }
 0x3ae   :  { %961 = vsyncpa [#allocation6], 1 }
 0x3af   :  { %963 = vsyncpa [#allocation6 + $0x1], 1 }
 0x3b0   :  { %964 = vsyncpa [#allocation9], 1 }
 0x3b1   :  { %965 = vsyncpa [#allocation4], 1 }
 0x3b2   :  { %967 = vsyncpa [#allocation4 + $0x1], 1 }
 0x3b3   :  { %968 = vsyncpa [#allocation13], 1 }
 0x3b4   :  { %970 = vsyncpa [#allocation13 + $0x1], 1 }

</bundles_post_ra>
